<compile_context>
chip_gen: v6e
topology: v6e:2x2x1
jax: 0.10.0
libtpu: 0.0.40
codegen_flags: <defaults>
</compile_context>

<pallas_src>
import jax
import jax.numpy as jnp
from jax.experimental import pallas as pl
from jax.experimental.pallas import tpu as pltpu

LANE = 128
SUBLANE = 8
_TARGET_BLOCK_BYTES = 4 << 20   # ~4 MiB per pipeline block (f32)
MIN_GRID_STEPS = 8              # keep the pipeline (and v7x 2-TC split) busy


def _round_up(x, m):
    return ((x + m - 1) // m) * m


def _cdiv(a, b):
    return (a + b - 1) // b


def _slab_geometry(n_plane):
    """Geometry for the combined (re ‖ im) f32 slab, one plane of length n_plane."""
    n128 = _round_up(max(n_plane, 1), LANE)
    width = LANE
    for cand in (2048, 1024, 512, 256):     # widest lane-dense slab that divides
        if n128 % cand == 0:
            width = cand
            break
    rows_plane = n128 // width
    total_rows = 2 * rows_plane             # real rows followed by imag rows

    target_rows = max(SUBLANE, (_TARGET_BLOCK_BYTES // (width * 4)) // SUBLANE * SUBLANE)
    steps = max(MIN_GRID_STEPS, _cdiv(total_rows, target_rows))
    block_rows = _round_up(_cdiv(total_rows, steps), SUBLANE)
    slab_rows = _round_up(total_rows, block_rows)   # exact grid, tail rows padded
    return rows_plane, width, block_rows, slab_rows


def _prelu_kernel(alpha_ref, x_ref, o_ref):
    # alpha_ref lives in SMEM: the single shared PReLU slope.
    a = alpha_ref[0]
    x = x_ref[...]
    o_ref[...] = jnp.where(x >= 0, x, a * x)


def _prelu_pallas(slab, alpha, block_rows):
    """PReLU over a lane-dense (slab_rows, width) f32 slab, tiled along rows."""
    slab_rows, width = slab.shape
    grid = (slab_rows // block_rows,)
    data_spec = pl.BlockSpec((block_rows, width), lambda i: (i, 0))
    n_slab = slab_rows * width
    alpha_arr = jnp.asarray(alpha, jnp.float32).reshape((1,))

    return pl.pallas_call(
        _prelu_kernel,
        out_shape=jax.ShapeDtypeStruct((slab_rows, width), jnp.float32),
        grid_spec=pl.GridSpec(
            grid=grid,
            in_specs=[
                pl.BlockSpec(memory_space=pltpu.SMEM),  # alpha scalar (whole array)
                data_spec,                              # stacked re|im slab tiles
            ],
            out_specs=data_spec,
        ),
        compiler_params=pltpu.CompilerParams(
            dimension_semantics=("parallel",),          # lets v7x use both TCs
            vmem_limit_bytes=48 << 20,                  # headroom for 4 MiB blocks x 2 bufs x 2 streams
        ),
        cost_estimate=pl.CostEstimate(
            flops=2 * n_slab,
            transcendentals=0,
            bytes_accessed=8 * n_slab,                  # 4 B read + 4 B write per f32 elem
        ),
        input_output_aliases={1: 0},                    # write the result in place of the slab
    )(alpha_arr, slab)


def complex_prelu_planes(re, im, alpha):
    """Fusion-friendly boundary: PReLU applied to split real/imag f32 planes.

    Takes/returns float32 arrays of identical shape, so the neighbouring ops in
    a model can fuse the (re, im) production/consumption and the only HBM pass
    paid here is the 16 B/elem kernel pass.
    """
    shape = re.shape
    n = int(re.size)
    rows_plane, width, block_rows, slab_rows = _slab_geometry(n)
    plane_elems = rows_plane * width

    re_f = re.astype(jnp.float32).reshape(-1)
    im_f = im.astype(jnp.float32).reshape(-1)
    planes = jnp.stack([re_f, im_f])                    # (2, n)
    pad_plane = plane_elems - n
    if pad_plane:
        planes = jnp.pad(planes, ((0, 0), (0, pad_plane)))
    slab = planes.reshape(2 * rows_plane, width)        # re rows then im rows
    pad_rows = slab_rows - 2 * rows_plane
    if pad_rows:
        slab = jnp.pad(slab, ((0, pad_rows), (0, 0)))

    out_slab = _prelu_pallas(slab, alpha, block_rows)

    out_flat = out_slab[: 2 * rows_plane].reshape(2, plane_elems)
    out_re = out_flat[0, :n].reshape(shape)
    out_im = out_flat[1, :n].reshape(shape)
    return out_re, out_im


def complex_prelu(x_complex, alpha):
    """ComplexPReLU forward: complex array in -> complex array out.

    NOTE: pallas_call is a fusion barrier and Mosaic has no complex dtype, so
    the real/imag split below and the lax.complex recombine are each a separate
    full HBM pass on top of the kernel pass.  Prefer complex_prelu_planes(...)
    when this op sits between other JAX ops.
    """
    # TODO(synk): complex128 inputs are computed in float32 planes (Mosaic has no
    # f64 path); the result is cast back to the input dtype, so precision (not
    # dtype) differs from a true f64 PReLU.
    re = jnp.real(x_complex).astype(jnp.float32)
    im = jnp.imag(x_complex).astype(jnp.float32)
    out_re, out_im = complex_prelu_planes(re, im, alpha)
    return jax.lax.complex(out_re, out_im).astype(x_complex.dtype)


if __name__ == "__main__":
    key = jax.random.PRNGKey(0)
    k1, k2, k3, k4 = jax.random.split(key, 4)

    alpha = jnp.float32(0.25)  # torch.nn.PReLU() default (num_parameters=1, init=0.25)
    fn = jax.jit(complex_prelu)

    def prelu_ref(v):
        return jnp.where(v >= 0, v, alpha * v)

    # Primary check: small NCHW-shaped complex input (conv-pipeline layout).
    B, C, H, W = 2, 4, 16, 16
    xr = jax.random.normal(k1, (B, C, H, W), dtype=jnp.float32)
    xi = jax.random.normal(k2, (B, C, H, W), dtype=jnp.float32)
    x = jax.lax.complex(xr, xi)
    y = jax.block_until_ready(fn(x, alpha))
    y_ref = jax.lax.complex(prelu_ref(xr), prelu_ref(xi))
    assert y.shape == x.shape and y.dtype == x.dtype
    assert jnp.allclose(y, y_ref, atol=1e-6, rtol=1e-6)

    # Secondary check: awkward (non-aligned) size exercising tail padding and a
    # multi-step pipelined grid.
    xr2 = jax.random.normal(k3, (3, 5, 19, 23), dtype=jnp.float32)
    xi2 = jax.random.normal(k4, (3, 5, 19, 23), dtype=jnp.float32)
    x2 = jax.lax.complex(xr2, xi2)
    y2 = jax.block_until_ready(fn(x2, alpha))
    y2_ref = jax.lax.complex(prelu_ref(xr2), prelu_ref(xi2))
    assert y2.shape == x2.shape and y2.dtype == x2.dtype
    assert jnp.allclose(y2, y2_ref, atol=1e-6, rtol=1e-6)

    # Fusion-friendly split-planes entry point (preferred boundary in a model).
    or3, oi3 = jax.block_until_ready(jax.jit(complex_prelu_planes)(xr, xi, alpha))
    assert jnp.allclose(or3, prelu_ref(xr), atol=1e-6, rtol=1e-6)
    assert jnp.allclose(oi3, prelu_ref(xi), atol=1e-6, rtol=1e-6)

    print("KERNEL_OK")
</pallas_src>

<mosaic_0001>
module attributes {stable_mosaic.version = 11 : i64} {
  func.func @_prelu_kernel(%arg0: i32, %arg1: memref<1xf32, #tpu.memory_space<smem>>, %arg2: memref<8x2048xf32, #tpu.memory_space<vmem>>, %arg3: memref<8x2048xf32, #tpu.memory_space<vmem>>) attributes {dimension_semantics = [#tpu.dimension_semantics<parallel>], iteration_bounds = array<i64: 1>, scalar_prefetch = 0 : i64, scratch_operands = 0 : i64, tpu.core_type = #tpu.core_type<tc>, window_params = [{transform_indices = @transform_0, window_bounds = array<i64: 1>}, {transform_indices = @transform_1, window_bounds = array<i64: 8, 2048>}, {transform_indices = @transform_2, window_bounds = array<i64: 8, 2048>}]} {
    %c0 = arith.constant 0 : index
    %0 = memref.load %arg1[%c0] : memref<1xf32, #tpu.memory_space<smem>>
    %c0_0 = arith.constant 0 : index
    %c0_1 = arith.constant 0 : index
    %1 = vector.load %arg2[%c0_0, %c0_1] : memref<8x2048xf32, #tpu.memory_space<vmem>>, vector<8x2048xf32>
    %cst = arith.constant 0.000000e+00 : f32
    %2 = vector.broadcast %cst : f32 to vector<8x2048xf32>
    %3 = arith.cmpf oge, %1, %2 : vector<8x2048xf32>
    %4 = vector.broadcast %0 : f32 to vector<8x2048xf32>
    %5 = arith.mulf %4, %1 : vector<8x2048xf32>
    %6 = arith.select %3, %1, %5 : vector<8x2048xi1>, vector<8x2048xf32>
    %c0_2 = arith.constant 0 : index
    %c0_3 = arith.constant 0 : index
    %7 = vector.load %arg3[%c0_2, %c0_3] : memref<8x2048xf32, #tpu.memory_space<vmem>>, vector<8x2048xf32>
    tpu.vector_store %arg3[%c0_2, %c0_3], %6 {strides = array<i32>} : memref<8x2048xf32, #tpu.memory_space<vmem>>, vector<8x2048xf32>,
    return
  }
  func.func @transform_0(%arg0: i32) -> i32 {
    %c0_i32 = arith.constant 0 : i32
    %c0_i32_0 = arith.constant 0 : i32
    return %c0_i32 : i32
  }
  func.func @transform_1(%arg0: i32) -> (i32, i32) {
    %c0_i32 = arith.constant 0 : i32
    %c0_i32_0 = arith.constant 0 : i32
    return %arg0, %c0_i32 : i32, i32
  }
  func.func @transform_2(%arg0: i32) -> (i32, i32) {
    %c0_i32 = arith.constant 0 : i32
    %c0_i32_0 = arith.constant 0 : i32
    return %arg0, %c0_i32 : i32, i32
  }
}

</mosaic_0001>

<bundles_post_ra>
// kernel: custom-call.1
= control target key start
LH: loop header
LB: loop body
LE: loop exit
PB: predicated region body
PF: predicated region fallthrough
CT: control target
= control target key end

     0   :  { %s51_s0 = inlined_call_operand.hbm [shape: c64[2,4,16,16], index: 0, kind: input, shape index: {}]   ;;  %s52_s1 = inlined_call_operand.vmem [shape: f32[2,4,16,16], index: 1, kind: output, shape index: {}]  }
   0x1   :  { %s2_s8 = scalar_lea.hbm %s51_s0, 2048 }
   0x2   :  { %3 = vsyncpa [#allocation0], 0  ;;  %s4_s11 = sshll.u32 %s52_s1, 4  ;;  %s5_s11 = int_to_ptr.vmem [resolvable:$true] %s4_s11 }
   0x3   :  { %s20_s12 = scalar_lea.vmem %s5_s11, 2048  ;;  %p25_p1 = scmp.lt.s32.totalorder %s5_s11, %s5_s11 }
   0x4   :  { %p21_p0 = scmp.ne.s32.totalorder %s5_s11, %s20_s12  ;;  %p26_p2 = scmp.lt.s32.totalorder %s20_s12, %s20_s12 }
   0x6   :  { %p27_p3 = por %p26_p2, %p25_p1 }
   0x8   :  { %p28_p4 = pnand %p27_p3, %p21_p0 }
   0xa   :  { %31 = shalt.err (!%p28_p4)  }
   0xb   :  { %7 = dma.hbm_to_vmem [thread:$0]  %s2_s8, 2048, %s5_s11, [#allocation0] }
   0xc   :  { %33 = dma.done.wait [#allocation0], 2048  }
   0xd   :  { %34 = vsyncadd [#allocation0], 4294965248 }
   0xe   :  { %9 = vsyncpa [#allocation0], 1 }

// kernel: custom-call
= control target key start
LH: loop header
LB: loop body
LE: loop exit
PB: predicated region body
PF: predicated region fallthrough
CT: control target
= control target key end

     0   :  { %2 = vsyncpa [#allocation0], 0  ;;  %s47_s0 = inlined_call_operand.hbm [shape: c64[2,4,16,16], index: 0, kind: input, shape index: {}]   ;;  %s48_s1 = inlined_call_operand.vmem [shape: f32[2,4,16,16], index: 1, kind: output, shape index: {}]  }
   0x1   :  { %s3_s8 = sshll.u32 %s48_s1, 4  ;;  %s4_s8 = int_to_ptr.vmem [resolvable:$true] %s3_s8 }
   0x2   :  { %s17_s9 = scalar_lea.vmem %s4_s8, 2048  ;;  %p22_p1 = scmp.lt.s32.totalorder %s4_s8, %s4_s8 }
   0x3   :  { %p18_p0 = scmp.ne.s32.totalorder %s4_s8, %s17_s9  ;;  %p23_p2 = scmp.lt.s32.totalorder %s17_s9, %s17_s9 }
   0x5   :  { %p24_p3 = por %p23_p2, %p22_p1 }
   0x7   :  { %p25_p4 = pnand %p24_p3, %p18_p0 }
   0x9   :  { %28 = shalt.err (!%p25_p4)  }
   0xa   :  { %6 = dma.hbm_to_vmem [thread:$0]  %s47_s0, 2048, %s4_s8, [#allocation0] }
   0xb   :  { %29 = dma.done.wait [#allocation0], 2048  }
   0xc   :  { %30 = vsyncadd [#allocation0], 4294965248 }
   0xd   :  { %8 = vsyncpa [#allocation0], 1 }

// kernel: custom-call.2
= control target key start
LH: loop header
LB: loop body
LE: loop exit
PB: predicated region body
PF: predicated region fallthrough
CT: control target
= control target key end

     0   :  { %s92_s0 = inlined_call_operand.vmem [shape: f32[2,4,16,16], index: 0, kind: input, shape index: {}]   ;;  %s93_s1 = inlined_call_operand.vmem [shape: f32[2,4,16,16], index: 1, kind: input, shape index: {}]   ;;  %s94_s2 = inlined_call_operand.hbm [shape: c64[2,4,16,16], index: 2, kind: output, shape index: {}]  }
   0x1   :  { %s3_s11 = scalar_lea.hbm %s94_s2, 2048 }
   0x2   :  { %4 = vsyncpa [#allocation0], 0  ;;  %s5_s14 = sshll.u32 %s92_s0, 4  ;;  %s6_s14 = int_to_ptr.vmem [resolvable:$true] %s5_s14 }
   0x3   :  { %s18_s15 = scalar_lea.vmem %s6_s14, 2048  ;;  %p23_p1 = scmp.lt.s32.totalorder %s6_s14, %s6_s14 }
   0x4   :  { %p19_p0 = scmp.ne.s32.totalorder %s6_s14, %s18_s15  ;;  %p24_p2 = scmp.lt.s32.totalorder %s18_s15, %s18_s15 }
   0x6   :  { %p25_p3 = por %p24_p2, %p23_p1 }
   0x8   :  { %p26_p4 = pnand %p25_p3, %p19_p0 }
   0xa   :  { %29 = shalt.err (!%p26_p4)  }
   0xb   :  { %8 = dma.vmem_to_hbm [thread:$0]  %s6_s14, 2048, %s94_s2, [#allocation0] }
   0xc   :  { %61 = dma.done.wait [#allocation0], 2048  }
   0xd   :  { %62 = vsyncadd [#allocation0], 4294965248 }
   0xe   :  { %10 = vsyncpa [#allocation0], 1 }
   0xf   :  { %11 = vsyncpa [#allocation1], 0  ;;  %s12_s0 = sshll.u32 %s93_s1, 4  ;;  %s13_s0 = int_to_ptr.vmem [resolvable:$true] %s12_s0 }
  0x10   :  { %s38_s20 = scalar_lea.vmem %s13_s0, 2048  ;;  %p43_p6 = scmp.lt.s32.totalorder %s13_s0, %s13_s0 }
  0x11   :  { %p39_p5 = scmp.ne.s32.totalorder %s13_s0, %s38_s20  ;;  %p44_p7 = scmp.lt.s32.totalorder %s38_s20, %s38_s20 }
  0x13   :  { %p45_p8 = por %p44_p7, %p43_p6 }
  0x15   :  { %p46_p9 = pnand %p45_p8, %p39_p5 }
  0x17   :  { %49 = shalt.err (!%p46_p9)  }
  0x18   :  { %15 = dma.vmem_to_hbm [thread:$0]  %s13_s0, 2048, %s3_s11, [#allocation1] }
  0x19   :  { %63 = dma.done.wait [#allocation1], 2048  }
  0x1a   :  { %64 = vsyncadd [#allocation1], 4294965248 }
  0x1b   :  { %17 = vsyncpa [#allocation1], 1 }

// kernel: squeeze.3
= control target key start
LH: loop header
LB: loop body
LE: loop exit
PB: predicated region body
PF: predicated region fallthrough
CT: control target
= control target key end

     0   :  { %vm3_vm0 = vcmask 130048   ;;  %s178_s10 = smov 112   ;;  %s179_s19 = smov 80   ;;  %s328_s0 = inlined_call_operand.vmem [shape: f32[2048], index: 0, kind: input, shape index: {}]   ;;  %s329_s1 = inlined_call_operand.vmem [shape: f32[2,4,16,16], index: 1, kind: output, shape index: {}]  }
   0x1   :  { %v30_v0 = vld [vmem:[%s328_s0] sm:$0xff]   ;;  %v142_v1 = vld [vmem:[%s328_s0 + $0x8] sm:$0xff]   ;;  %s177_s0 = smov 96   ;;  %s180_s20 = smov 64  }
   0x2   :  { %31 = vrot.lane.b32.xlu1 %v30_v0, %s177_s0  ;;  %14 = vrot.lane.b32.xlu0 %v30_v0, %s178_s10  ;;  %4 = vst.msk [vmem:[%s329_s1] ss:$8 sm:$0xf] %vm3_vm0, %v30_v0   ;;  %5 = vst.msk [vmem:[%s329_s1] ss:$8 sm:$0xf0] %vm3_vm0, %v30_v0  }
   0x3   :  { %133 = vst.msk [vmem:[%s329_s1 + $0x40] ss:$8 sm:$0xf] %vm3_vm0, %v142_v1   ;;  %134 = vst.msk [vmem:[%s329_s1 + $0x40] ss:$8 sm:$0xf0] %vm3_vm0, %v142_v1  }
   0x4   :  { %s181_s21 = smov 48   ;;  %s182_s22 = smov 32  }
   0x5   :  { %s183_s23 = smov 16  }
   0x6   :  { %40 = vrot.lane.b32.xlu1 %v142_v1, %s177_s0  ;;  %23 = vrot.lane.b32.xlu0 %v142_v1, %s178_s10 }
   0xa   :  { %57 = vrot.lane.b32.xlu1 %v142_v1, %s179_s19  ;;  %48 = vrot.lane.b32.xlu0 %v30_v0, %s179_s19 }
   0xe   :  { %74 = vrot.lane.b32.xlu1 %v142_v1, %s180_s20  ;;  %65 = vrot.lane.b32.xlu0 %v30_v0, %s180_s20 }
  0x12   :  { %91 = vrot.lane.b32.xlu1 %v142_v1, %s181_s21  ;;  %82 = vrot.lane.b32.xlu0 %v30_v0, %s181_s21 }
  0x16   :  { %108 = vrot.lane.b32.xlu1 %v142_v1, %s182_s22  ;;  %99 = vrot.lane.b32.xlu0 %v30_v0, %s182_s22 }
  0x1a   :  { %125 = vrot.lane.b32.xlu1 %v142_v1, %s183_s23  ;;  %116 = vrot.lane.b32.xlu0 %v30_v0, %s183_s23 }
  0x74   :  { %v32_v2 = vpop.permute.xlu1 %31   ;;  %v15_v3 = vpop.permute.xlu0 %14  }
  0x75   :  { %140 = vst.msk [vmem:[%s329_s1 + $0x2] ss:$8 sm:$0xf] %vm3_vm0, %v32_v2   ;;  %141 = vst.msk [vmem:[%s329_s1 + $0x2] ss:$8 sm:$0xf0] %vm3_vm0, %v32_v2  }
  0x76   :  { %135 = vst.msk [vmem:[%s329_s1 + $0x1] ss:$8 sm:$0xf] %vm3_vm0, %v15_v3   ;;  %136 = vst.msk [vmem:[%s329_s1 + $0x1] ss:$8 sm:$0xf0] %vm3_vm0, %v15_v3  }
  0x78   :  { %v41_v4 = vpop.permute.xlu1 %40   ;;  %v24_v5 = vpop.permute.xlu0 %23  }
  0x79   :  { %143 = vst.msk [vmem:[%s329_s1 + $0x42] ss:$8 sm:$0xf] %vm3_vm0, %v41_v4   ;;  %144 = vst.msk [vmem:[%s329_s1 + $0x42] ss:$8 sm:$0xf0] %vm3_vm0, %v41_v4  }
  0x7a   :  { %138 = vst.msk [vmem:[%s329_s1 + $0x41] ss:$8 sm:$0xf] %vm3_vm0, %v24_v5   ;;  %139 = vst.msk [vmem:[%s329_s1 + $0x41] ss:$8 sm:$0xf0] %vm3_vm0, %v24_v5  }
  0x7c   :  { %v58_v6 = vpop.permute.xlu1 %57   ;;  %v49_v7 = vpop.permute.xlu0 %48  }
  0x7d   :  { %148 = vst.msk [vmem:[%s329_s1 + $0x43] ss:$8 sm:$0xf] %vm3_vm0, %v58_v6   ;;  %149 = vst.msk [vmem:[%s329_s1 + $0x43] ss:$8 sm:$0xf0] %vm3_vm0, %v58_v6  }
  0x7e   :  { %145 = vst.msk [vmem:[%s329_s1 + $0x3] ss:$8 sm:$0xf] %vm3_vm0, %v49_v7   ;;  %146 = vst.msk [vmem:[%s329_s1 + $0x3] ss:$8 sm:$0xf0] %vm3_vm0, %v49_v7  }
  0x80   :  { %v75_v8 = vpop.permute.xlu1 %74   ;;  %v66_v9 = vpop.permute.xlu0 %65  }
  0x81   :  { %153 = vst.msk [vmem:[%s329_s1 + $0x44] ss:$8 sm:$0xf] %vm3_vm0, %v75_v8   ;;  %154 = vst.msk [vmem:[%s329_s1 + $0x44] ss:$8 sm:$0xf0] %vm3_vm0, %v75_v8  }
  0x82   :  { %150 = vst.msk [vmem:[%s329_s1 + $0x4] ss:$8 sm:$0xf] %vm3_vm0, %v66_v9   ;;  %151 = vst.msk [vmem:[%s329_s1 + $0x4] ss:$8 sm:$0xf0] %vm3_vm0, %v66_v9  }
  0x84   :  { %v92_v10 = vpop.permute.xlu1 %91   ;;  %v83_v11 = vpop.permute.xlu0 %82  }
  0x85   :  { %158 = vst.msk [vmem:[%s329_s1 + $0x45] ss:$8 sm:$0xf] %vm3_vm0, %v92_v10   ;;  %159 = vst.msk [vmem:[%s329_s1 + $0x45] ss:$8 sm:$0xf0] %vm3_vm0, %v92_v10  }
  0x86   :  { %155 = vst.msk [vmem:[%s329_s1 + $0x5] ss:$8 sm:$0xf] %vm3_vm0, %v83_v11   ;;  %156 = vst.msk [vmem:[%s329_s1 + $0x5] ss:$8 sm:$0xf0] %vm3_vm0, %v83_v11  }
  0x88   :  { %v109_v12 = vpop.permute.xlu1 %108   ;;  %v100_v13 = vpop.permute.xlu0 %99  }
  0x89   :  { %163 = vst.msk [vmem:[%s329_s1 + $0x46] ss:$8 sm:$0xf] %vm3_vm0, %v109_v12   ;;  %164 = vst.msk [vmem:[%s329_s1 + $0x46] ss:$8 sm:$0xf0] %vm3_vm0, %v109_v12  }
  0x8a   :  { %160 = vst.msk [vmem:[%s329_s1 + $0x6] ss:$8 sm:$0xf] %vm3_vm0, %v100_v13   ;;  %161 = vst.msk [vmem:[%s329_s1 + $0x6] ss:$8 sm:$0xf0] %vm3_vm0, %v100_v13  }
  0x8c   :  { %v126_v14 = vpop.permute.xlu1 %125   ;;  %v117_v15 = vpop.permute.xlu0 %116  }
  0x8d   :  { %168 = vst.msk [vmem:[%s329_s1 + $0x47] ss:$8 sm:$0xf] %vm3_vm0, %v126_v14   ;;  %169 = vst.msk [vmem:[%s329_s1 + $0x47] ss:$8 sm:$0xf0] %vm3_vm0, %v126_v14  }
  0x8e   :  { %165 = vst.msk [vmem:[%s329_s1 + $0x7] ss:$8 sm:$0xf] %vm3_vm0, %v117_v15   ;;  %166 = vst.msk [vmem:[%s329_s1 + $0x7] ss:$8 sm:$0xf0] %vm3_vm0, %v117_v15  }

// kernel: complex_prelu.1
= control target key start
LH: loop header
LB: loop body
LE: loop exit
PB: predicated region body
PF: predicated region fallthrough
CT: control target
= control target key end

     0   :  { %s232_s0 = inlined_call_operand.<no memory space> [shape: f32[1], index: 0, kind: input, shape index: {}]   ;;  %s233_s1 = inlined_call_operand.vmem [shape: f32[8,2048], index: 1, kind: input, shape index: {}, may-alias: {1,2}]   ;;  %s234_s2 = inlined_call_operand.vmem [shape: f32[8,2048], index: 2, kind: output, shape index: {}, may-alias: {1,2}]  }
   0x1   :  { %v13_v0 = vld [vmem:[%s233_s1] sm:$0xff]  ;;  %v119_v1 = vstv %s232_s0  ;;  %v14_v2 = vld [vmem:[%s233_s1 + $0x8] sm:$0xff]  ;;  %v15_v3 = vld [vmem:[%s233_s1 + $0x10] sm:$0xff] }
   0x2   :  { %vm29_vm0 = vcmp.ge.f32.partialorder %v13_v0, 0.0  ;;  %v46_v4 = vmul.f32 %v119_v1, %v13_v0  ;;  %vm30_vm1 = vcmp.ge.f32.partialorder %v14_v2, 0.0  ;;  %v47_v5 = vmul.f32 %v119_v1, %v14_v2  ;;  %v16_v6 = vld [vmem:[%s233_s1 + $0x18] sm:$0xff]  ;;  %v17_v7 = vld [vmem:[%s233_s1 + $0x20] sm:$0xff]  ;;  %v18_v8 = vld [vmem:[%s233_s1 + $0x28] sm:$0xff] }
   0x3   :  { %vm31_vm2 = vcmp.ge.f32.partialorder %v15_v3, 0.0  ;;  %v48_v9 = vmul.f32 %v119_v1, %v15_v3  ;;  %vm32_vm3 = vcmp.ge.f32.partialorder %v16_v6, 0.0  ;;  %v49_v10 = vmul.f32 %v119_v1, %v16_v6  ;;  %v19_v11 = vld [vmem:[%s233_s1 + $0x30] sm:$0xff]  ;;  %v20_v12 = vld [vmem:[%s233_s1 + $0x38] sm:$0xff]  ;;  %v21_v16 = vld [vmem:[%s233_s1 + $0x40] sm:$0xff] }
   0x4   :  { %v62_v13 = vsel %vm29_vm0, %v13_v0, %v46_v4  ;;  %v63_v14 = vsel %vm30_vm1, %v14_v2, %v47_v5  ;;  %vm33_vm4 = vcmp.ge.f32.partialorder %v17_v7, 0.0  ;;  %v50_v15 = vmul.f32 %v119_v1, %v17_v7 }
   0x5   :  { %78 = vst [vmem:[%s234_s2] sm:$0xff] %v62_v13  ;;  %79 = vst [vmem:[%s234_s2 + $0x8] sm:$0xff] %v63_v14  ;;  %v64_v17 = vsel %vm31_vm2, %v15_v3, %v48_v9  ;;  %v65_v18 = vsel %vm32_vm3, %v16_v6, %v49_v10  ;;  %vm34_vm5 = vcmp.ge.f32.partialorder %v18_v8, 0.0  ;;  %v51_v19 = vmul.f32 %v119_v1, %v18_v8 }
   0x6   :  { %v66_v22 = vsel %vm33_vm4, %v17_v7, %v50_v15  ;;  %vm35_vm6 = vcmp.ge.f32.partialorder %v19_v11, 0.0  ;;  %v52_v23 = vmul.f32 %v119_v1, %v19_v11  ;;  %vm36_vm7 = vcmp.ge.f32.partialorder %v20_v12, 0.0 }
   0x7   :  { %v67_v25 = vsel %vm34_vm5, %v18_v8, %v51_v19  ;;  %v53_v26 = vmul.f32 %v119_v1, %v20_v12  ;;  %vm37_vm8 = vcmp.ge.f32.partialorder %v21_v16, 0.0  ;;  %v54_v27 = vmul.f32 %v119_v1, %v21_v16 }
   0x8   :  { %v68_v29 = vsel %vm35_vm6, %v19_v11, %v52_v23 }
   0x9   :  { %v69_v33 = vsel %vm36_vm7, %v20_v12, %v53_v26  ;;  %v70_v34 = vsel %vm37_vm8, %v21_v16, %v54_v27 }
   0xc   :  { %v22_v20 = vld [vmem:[%s233_s1 + $0x48] sm:$0xff]  ;;  %v23_v21 = vld [vmem:[%s233_s1 + $0x50] sm:$0xff] }
   0xd   :  { %80 = vst [vmem:[%s234_s2 + $0x10] sm:$0xff] %v64_v17  ;;  %81 = vst [vmem:[%s234_s2 + $0x18] sm:$0xff] %v65_v18  ;;  %vm38_vm9 = vcmp.ge.f32.partialorder %v22_v20, 0.0  ;;  %v55_v30 = vmul.f32 %v119_v1, %v22_v20  ;;  %vm39_vm10 = vcmp.ge.f32.partialorder %v23_v21, 0.0  ;;  %v56_v35 = vmul.f32 %v119_v1, %v23_v21 }
   0xf   :  { %v71_v37 = vsel %vm38_vm9, %v22_v20, %v55_v30  ;;  %v72_v40 = vsel %vm39_vm10, %v23_v21, %v56_v35 }
  0x14   :  { %v24_v24 = vld [vmem:[%s233_s1 + $0x58] sm:$0xff] }
  0x15   :  { %82 = vst [vmem:[%s234_s2 + $0x20] sm:$0xff] %v66_v22  ;;  %vm40_vm11 = vcmp.ge.f32.partialorder %v24_v24, 0.0  ;;  %v57_v38 = vmul.f32 %v119_v1, %v24_v24 }
  0x17   :  { %v73_v42 = vsel %vm40_vm11, %v24_v24, %v57_v38 }
  0x1c   :  { %v25_v28 = vld [vmem:[%s233_s1 + $0x60] sm:$0xff] }
  0x1d   :  { %83 = vst [vmem:[%s234_s2 + $0x28] sm:$0xff] %v67_v25  ;;  %vm41_vm12 = vcmp.ge.f32.partialorder %v25_v28, 0.0  ;;  %v58_v39 = vmul.f32 %v119_v1, %v25_v28 }
  0x1f   :  { %v74_v43 = vsel %vm41_vm12, %v25_v28, %v58_v39 }
  0x24   :  { %v26_v31 = vld [vmem:[%s233_s1 + $0x68] sm:$0xff]  ;;  %v27_v32 = vld [vmem:[%s233_s1 + $0x70] sm:$0xff] }
  0x25   :  { %84 = vst [vmem:[%s234_s2 + $0x30] sm:$0xff] %v68_v29  ;;  %vm42_vm13 = vcmp.ge.f32.partialorder %v26_v31, 0.0  ;;  %v59_v41 = vmul.f32 %v119_v1, %v26_v31  ;;  %vm43_vm14 = vcmp.ge.f32.partialorder %v27_v32, 0.0  ;;  %v60_v44 = vmul.f32 %v119_v1, %v27_v32 }
  0x27   :  { %v75_v45 = vsel %vm42_vm13, %v26_v31, %v59_v41  ;;  %v76_v47 = vsel %vm43_vm14, %v27_v32, %v60_v44 }
  0x2c   :  { %v28_v36 = vld [vmem:[%s233_s1 + $0x78] sm:$0xff] }
  0x2d   :  { %85 = vst [vmem:[%s234_s2 + $0x38] sm:$0xff] %v69_v33  ;;  %86 = vst [vmem:[%s234_s2 + $0x40] sm:$0xff] %v70_v34  ;;  %vm44_vm15 = vcmp.ge.f32.partialorder %v28_v36, 0.0  ;;  %v61_v46 = vmul.f32 %v119_v1, %v28_v36 }
  0x2e   :  { %87 = vst [vmem:[%s234_s2 + $0x48] sm:$0xff] %v71_v37  ;;  %88 = vst [vmem:[%s234_s2 + $0x50] sm:$0xff] %v72_v40 }
  0x2f   :  { %89 = vst [vmem:[%s234_s2 + $0x58] sm:$0xff] %v73_v42  ;;  %90 = vst [vmem:[%s234_s2 + $0x60] sm:$0xff] %v74_v43  ;;  %v77_v48 = vsel %vm44_vm15, %v28_v36, %v61_v46 }
  0x30   :  { %91 = vst [vmem:[%s234_s2 + $0x68] sm:$0xff] %v75_v45  ;;  %92 = vst [vmem:[%s234_s2 + $0x70] sm:$0xff] %v76_v47 }
  0x31   :  { %93 = vst [vmem:[%s234_s2 + $0x78] sm:$0xff] %v77_v48 }

</bundles_post_ra>
